<compile_context>
chip_gen: v5e
topology: v5e:2x2
jax: 0.10.0
libtpu: 0.0.40
codegen_flags: <defaults>
</compile_context>

<pallas_src>
import jax
import jax.numpy as jnp
from jax.experimental import pallas as pl
from jax.experimental.pallas import tpu as pltpu


def _cdiv(a, b):
    return -(-a // b)


def _round_up(a, m):
    return _cdiv(a, m) * m


def _choose_group_tile(n_groups, max_groups_per_tile):
    """Tile size in packed rows (1 packed row == 8 batch rows)."""
    if n_groups * 8 < 2048:          # small batch: one step, overhead-dominated anyway
        return n_groups
    steps = _cdiv(n_groups, max_groups_per_tile)
    if steps < 2:
        steps = 2                    # >= 2 steps so both v7x TensorCores get work
    elif steps % 2:
        steps += 1                   # even step count keeps the 2 TCs balanced
    return _round_up(_cdiv(n_groups, steps), 8)


def _mlp_kernel(state_ref, action_ref, w1s_ref, w1a_ref, b1_ref,
                w2_ref, b2_ref, w3_ref, b3_ref, maxobs_ref, out_ref):
    # All refs hold lane-packed data (8 batch rows per packed row); the weights are
    # 8-copy block-diagonal, so plain dense matmuls implement the per-row MLP.
    wdt = w1s_ref.dtype
    s = state_ref[...].astype(wdt)                               # (TG, 8*S)
    a = action_ref[...].astype(wdt)                              # (TG, 8*A)

    # Fused concat: cat([s, a], 1) @ W1 == s @ W1[:S] + a @ W1[S:]   (block-diag form)
    h = jnp.dot(s, w1s_ref[...], preferred_element_type=jnp.float32)
    h = h + jnp.dot(a, w1a_ref[...], preferred_element_type=jnp.float32)
    h = jnp.maximum(h + b1_ref[...].astype(jnp.float32), 0.0)    # relu(l1)

    h = jnp.dot(h.astype(wdt), w2_ref[...], preferred_element_type=jnp.float32)
    h = jnp.maximum(h + b2_ref[...].astype(jnp.float32), 0.0)    # relu(l2)

    y = jnp.dot(h.astype(wdt), w3_ref[...], preferred_element_type=jnp.float32)
    y = y + b3_ref[...].astype(jnp.float32)                      # l3

    out_ref[...] = (maxobs_ref[...].astype(jnp.float32)
                    * jnp.tanh(y)).astype(out_ref.dtype)         # max_obs * tanh


def deterministic_model_forward(state, action, params, max_observation,
                                *, tile_batch=8192, out_dtype=None):
    """Pallas forward of DeterministicModel.

    state:  (B, state_dim)   f32 or bf16
    action: (B, action_dim)  f32 or bf16
    params: dict w1,b1,w2,b2,w3,b3 (weights [in, out], biases [1, out]); f32 or bf16
    max_observation: (state_dim,) f32
    """
    B, state_dim = state.shape
    action_dim = action.shape[1]
    out_dtype = state.dtype if out_dtype is None else out_dtype

    w1, b1 = params["w1"], params["b1"]
    w2, b2 = params["w2"], params["b2"]
    w3, b3 = params["w3"], params["b3"]
    h1, h2 = w1.shape[1], w2.shape[1]
    wdt = w1.dtype

    G = 8  # batch rows folded into the lane axis per packed row

    # --- pack 8 batch rows per lane-row (free reshape; zero-pad ragged batch) ----
    Bp = _round_up(B, G)
    if Bp != B:
        pad = ((0, Bp - B), (0, 0))
        state = jnp.pad(state, pad)
        action = jnp.pad(action, pad)
    n_groups = Bp // G
    state_p = state.reshape(n_groups, G * state_dim)
    action_p = action.reshape(n_groups, G * action_dim)

    # --- 8-copy block-diagonal weights / tiled biases (trace-time constants) -----
    eye = jnp.eye(G, dtype=wdt)
    w1s_bd = jnp.kron(eye, w1[:state_dim])            # (G*S,  G*h1)
    w1a_bd = jnp.kron(eye, w1[state_dim:])            # (G*A,  G*h1)
    w2_bd = jnp.kron(eye, w2)                         # (G*h1, G*h2)
    w3_bd = jnp.kron(eye, w3)                         # (G*h2, G*S)
    b1_t = jnp.tile(b1.reshape(1, h1), (1, G))
    b2_t = jnp.tile(b2.reshape(1, h2), (1, G))
    b3_t = jnp.tile(b3.reshape(1, state_dim), (1, G))
    mo_t = jnp.tile(max_observation.reshape(1, state_dim).astype(jnp.float32), (1, G))

    SP, AP = G * state_dim, G * action_dim

    # --- tiling: big tiles, even (>=2) step count for large B (v7x megacore) -----
    TG = _choose_group_tile(n_groups, max(1, tile_batch // G))
    grid = (_cdiv(n_groups, TG),)

    tiled = lambda ncol: pl.BlockSpec((TG, ncol), lambda i: (i, 0))
    resident = lambda arr: pl.BlockSpec(arr.shape, lambda i: (0, 0))

    out_itemsize = jax.ShapeDtypeStruct((), out_dtype).dtype.itemsize
    flops = 2 * B * ((state_dim + action_dim) * h1 + h1 * h2 + h2 * state_dim)
    bytes_accessed = sum(int(a.size) * a.dtype.itemsize
                         for a in (state_p, action_p, w1s_bd, w1a_bd, b1_t,
                                   w2_bd, b2_t, w3_bd, b3_t, mo_t))
    bytes_accessed += n_groups * SP * out_itemsize
    cost = pl.CostEstimate(flops=flops, transcendentals=B * state_dim,
                           bytes_accessed=bytes_accessed)

    out_p = pl.pallas_call(
        _mlp_kernel,
        out_shape=jax.ShapeDtypeStruct((n_groups, SP), out_dtype),
        grid=grid,
        in_specs=[tiled(SP), tiled(AP),
                  resident(w1s_bd), resident(w1a_bd), resident(b1_t),
                  resident(w2_bd), resident(b2_t),
                  resident(w3_bd), resident(b3_t),
                  resident(mo_t)],
        out_specs=pl.BlockSpec((TG, SP), lambda i: (i, 0)),
        compiler_params=pltpu.CompilerParams(dimension_semantics=("parallel",)),
        cost_estimate=cost,
    )(state_p, action_p, w1s_bd, w1a_bd, b1_t, w2_bd, b2_t, w3_bd, b3_t, mo_t)

    out = out_p.reshape(Bp, state_dim)
    return out[:B] if Bp != B else out


def init_params(key, state_dim, action_dim, hidden_size, dtype=jnp.float32):
    """nn.Linear-style init (uniform +-1/sqrt(fan_in)); weights stored [in, out].

    Use dtype=jnp.bfloat16 for the bf16 HBM-I/O / MXU fast path on v6e/v7x."""
    dims = [(state_dim + action_dim, hidden_size[0]),
            (hidden_size[0], hidden_size[1]),
            (hidden_size[1], state_dim)]
    params = {}
    keys = jax.random.split(key, 2 * len(dims))
    for i, (fan_in, fan_out) in enumerate(dims):
        bound = 1.0 / jnp.sqrt(jnp.float32(fan_in))
        w = jax.random.uniform(keys[2 * i], (fan_in, fan_out),
                               minval=-bound, maxval=bound,
                               dtype=jnp.float32).astype(dtype)
        b = jax.random.uniform(keys[2 * i + 1], (1, fan_out),
                               minval=-bound, maxval=bound,
                               dtype=jnp.float32).astype(dtype)
        params[f"w{i+1}"] = w
        params[f"b{i+1}"] = b
    return params


def _reference(state, action, params, max_observation):
    sa = jnp.concatenate([state, action], axis=1)
    h1 = jnp.maximum(sa @ params["w1"] + params["b1"], 0.0)
    h2 = jnp.maximum(h1 @ params["w2"] + params["b2"], 0.0)
    return max_observation * jnp.tanh(h2 @ params["w3"] + params["b3"])


if __name__ == "__main__":
    B = 8
    state_dim = 16
    action_dim = 8
    hidden_size = (32, 32)

    key = jax.random.PRNGKey(0)
    k_state, k_action, k_params, k_big = jax.random.split(key, 4)

    state = jax.random.normal(k_state, (B, state_dim), dtype=jnp.float32)
    action = jax.random.normal(k_action, (B, action_dim), dtype=jnp.float32)
    params = init_params(k_params, state_dim, action_dim, hidden_size)
    # observation_space.high analogue: deterministic positive bounds per state dim.
    max_observation = 1.0 + 0.1 * jnp.arange(state_dim, dtype=jnp.float32)

    out = jax.block_until_ready(
        deterministic_model_forward(state, action, params, max_observation))
    ref = _reference(state, action, params, max_observation)
    assert out.shape == (B, state_dim)
    assert jnp.allclose(out, ref, atol=1e-5, rtol=1e-5)

    # Ragged batch (exercises the zero-pad path).
    out7 = jax.block_until_ready(
        deterministic_model_forward(state[:7], action[:7], params, max_observation))
    assert out7.shape == (7, state_dim)
    assert jnp.allclose(out7, ref[:7], atol=1e-5, rtol=1e-5)

    # Large f32 batch: multi-step (even) grid, resident block-diag weights.
    Bb = 12288
    kb1, kb2 = jax.random.split(k_big)
    state_b = jax.random.normal(kb1, (Bb, state_dim), dtype=jnp.float32)
    action_b = jax.random.normal(kb2, (Bb, action_dim), dtype=jnp.float32)
    out_b = jax.block_until_ready(
        deterministic_model_forward(state_b, action_b, params, max_observation))
    ref_b = _reference(state_b, action_b, params, max_observation)
    assert out_b.shape == (Bb, state_dim)
    assert jnp.allclose(out_b, ref_b, atol=1e-5, rtol=1e-5)

    # bf16 HBM I/O fast path (v6e/v7x): bf16 weights + inputs, f32 math in-kernel.
    params_bf16 = init_params(k_params, state_dim, action_dim, hidden_size,
                              dtype=jnp.bfloat16)
    Bq = 4096
    state_q = state_b[:Bq].astype(jnp.bfloat16)
    action_q = action_b[:Bq].astype(jnp.bfloat16)
    out_q = jax.block_until_ready(
        deterministic_model_forward(state_q, action_q, params_bf16, max_observation))
    params_f32 = {k: v.astype(jnp.float32) for k, v in params_bf16.items()}
    ref_q = _reference(state_q.astype(jnp.float32), action_q.astype(jnp.float32),
                       params_f32, max_observation)
    assert out_q.shape == (Bq, state_dim) and out_q.dtype == jnp.bfloat16
    assert jnp.allclose(out_q.astype(jnp.float32), ref_q, atol=5e-2, rtol=5e-2)

    print("KERNEL_OK")
</pallas_src>

<mosaic_0001>
module attributes {stable_mosaic.version = 11 : i64} {
  func.func @_mlp_kernel(%arg0: i32, %arg1: memref<1x128xf32, #tpu.memory_space<vmem>>, %arg2: memref<1x64xf32, #tpu.memory_space<vmem>>, %arg3: memref<128x256xf32, #tpu.memory_space<vmem>>, %arg4: memref<64x256xf32, #tpu.memory_space<vmem>>, %arg5: memref<1x256xf32, #tpu.memory_space<vmem>>, %arg6: memref<256x256xf32, #tpu.memory_space<vmem>>, %arg7: memref<1x256xf32, #tpu.memory_space<vmem>>, %arg8: memref<256x128xf32, #tpu.memory_space<vmem>>, %arg9: memref<1x128xf32, #tpu.memory_space<vmem>>, %arg10: memref<1x128xf32, #tpu.memory_space<vmem>>, %arg11: memref<1x128xf32, #tpu.memory_space<vmem>>) attributes {dimension_semantics = [#tpu.dimension_semantics<parallel>], iteration_bounds = array<i64: 1>, scalar_prefetch = 0 : i64, scratch_operands = 0 : i64, tpu.core_type = #tpu.core_type<tc>, window_params = [{transform_indices = @transform_0, window_bounds = array<i64: 1, 128>}, {transform_indices = @transform_1, window_bounds = array<i64: 1, 64>}, {pipeline_mode = #tpu.pipeline_mode<synchronous>, transform_indices = @transform_2, window_bounds = array<i64: 128, 256>}, {pipeline_mode = #tpu.pipeline_mode<synchronous>, transform_indices = @transform_3, window_bounds = array<i64: 64, 256>}, {pipeline_mode = #tpu.pipeline_mode<synchronous>, transform_indices = @transform_4, window_bounds = array<i64: 1, 256>}, {pipeline_mode = #tpu.pipeline_mode<synchronous>, transform_indices = @transform_5, window_bounds = array<i64: 256, 256>}, {pipeline_mode = #tpu.pipeline_mode<synchronous>, transform_indices = @transform_6, window_bounds = array<i64: 1, 256>}, {pipeline_mode = #tpu.pipeline_mode<synchronous>, transform_indices = @transform_7, window_bounds = array<i64: 256, 128>}, {pipeline_mode = #tpu.pipeline_mode<synchronous>, transform_indices = @transform_8, window_bounds = array<i64: 1, 128>}, {pipeline_mode = #tpu.pipeline_mode<synchronous>, transform_indices = @transform_9, window_bounds = array<i64: 1, 128>}, {transform_indices = @transform_10, window_bounds = array<i64: 1, 128>}]} {
    %c0 = arith.constant 0 : index
    %c0_0 = arith.constant 0 : index
    %0 = vector.load %arg1[%c0, %c0_0] : memref<1x128xf32, #tpu.memory_space<vmem>>, vector<1x128xf32>
    %c0_1 = arith.constant 0 : index
    %c0_2 = arith.constant 0 : index
    %1 = vector.load %arg2[%c0_1, %c0_2] : memref<1x64xf32, #tpu.memory_space<vmem>>, vector<1x64xf32>
    %c0_3 = arith.constant 0 : index
    %c0_4 = arith.constant 0 : index
    %2 = vector.load %arg3[%c0_3, %c0_4] : memref<128x256xf32, #tpu.memory_space<vmem>>, vector<128x256xf32>
    %cst = arith.constant dense<0.000000e+00> : vector<1x256xf32>
    %3 = tpu.matmul %0, %2, %cst {dimension_numbers = #tpu.dot_dimension_numbers<[1], [0], [0], [1], [0, 0, 1, 1], [], []>} : vector<1x128xf32>, vector<128x256xf32>, vector<1x256xf32> -> vector<1x256xf32>
    %c0_5 = arith.constant 0 : index
    %c0_6 = arith.constant 0 : index
    %4 = vector.load %arg4[%c0_5, %c0_6] : memref<64x256xf32, #tpu.memory_space<vmem>>, vector<64x256xf32>
    %cst_7 = arith.constant dense<0.000000e+00> : vector<1x256xf32>
    %5 = tpu.matmul %1, %4, %cst_7 {dimension_numbers = #tpu.dot_dimension_numbers<[1], [0], [0], [1], [0, 0, 1, 1], [], []>} : vector<1x64xf32>, vector<64x256xf32>, vector<1x256xf32> -> vector<1x256xf32>
    %6 = arith.addf %3, %5 : vector<1x256xf32>
    %c0_8 = arith.constant 0 : index
    %c0_9 = arith.constant 0 : index
    %7 = vector.load %arg5[%c0_8, %c0_9] : memref<1x256xf32, #tpu.memory_space<vmem>>, vector<1x256xf32>
    %8 = arith.addf %6, %7 : vector<1x256xf32>
    %cst_10 = arith.constant 0.000000e+00 : f32
    %9 = vector.broadcast %cst_10 : f32 to vector<1x256xf32>
    %10 = arith.maximumf %8, %9 : vector<1x256xf32>
    %c0_11 = arith.constant 0 : index
    %c0_12 = arith.constant 0 : index
    %11 = vector.load %arg6[%c0_11, %c0_12] : memref<256x256xf32, #tpu.memory_space<vmem>>, vector<256x256xf32>
    %cst_13 = arith.constant dense<0.000000e+00> : vector<1x256xf32>
    %12 = tpu.matmul %10, %11, %cst_13 {dimension_numbers = #tpu.dot_dimension_numbers<[1], [0], [0], [1], [0, 0, 1, 1], [], []>} : vector<1x256xf32>, vector<256x256xf32>, vector<1x256xf32> -> vector<1x256xf32>
    %c0_14 = arith.constant 0 : index
    %c0_15 = arith.constant 0 : index
    %13 = vector.load %arg7[%c0_14, %c0_15] : memref<1x256xf32, #tpu.memory_space<vmem>>, vector<1x256xf32>
    %14 = arith.addf %12, %13 : vector<1x256xf32>
    %cst_16 = arith.constant 0.000000e+00 : f32
    %15 = vector.broadcast %cst_16 : f32 to vector<1x256xf32>
    %16 = arith.maximumf %14, %15 : vector<1x256xf32>
    %c0_17 = arith.constant 0 : index
    %c0_18 = arith.constant 0 : index
    %17 = vector.load %arg8[%c0_17, %c0_18] : memref<256x128xf32, #tpu.memory_space<vmem>>, vector<256x128xf32>
    %cst_19 = arith.constant dense<0.000000e+00> : vector<1x128xf32>
    %18 = tpu.matmul %16, %17, %cst_19 {dimension_numbers = #tpu.dot_dimension_numbers<[1], [0], [0], [1], [0, 0, 1, 1], [], []>} : vector<1x256xf32>, vector<256x128xf32>, vector<1x128xf32> -> vector<1x128xf32>
    %c0_20 = arith.constant 0 : index
    %c0_21 = arith.constant 0 : index
    %19 = vector.load %arg9[%c0_20, %c0_21] : memref<1x128xf32, #tpu.memory_space<vmem>>, vector<1x128xf32>
    %20 = arith.addf %18, %19 : vector<1x128xf32>
    %c0_22 = arith.constant 0 : index
    %c0_23 = arith.constant 0 : index
    %21 = vector.load %arg10[%c0_22, %c0_23] : memref<1x128xf32, #tpu.memory_space<vmem>>, vector<1x128xf32>
    %22 = math.tanh %20 : vector<1x128xf32>
    %23 = arith.mulf %21, %22 : vector<1x128xf32>
    %c0_24 = arith.constant 0 : index
    %c0_25 = arith.constant 0 : index
    %24 = vector.load %arg11[%c0_24, %c0_25] : memref<1x128xf32, #tpu.memory_space<vmem>>, vector<1x128xf32>
    tpu.vector_store %arg11[%c0_24, %c0_25], %23 {strides = array<i32>} : memref<1x128xf32, #tpu.memory_space<vmem>>, vector<1x128xf32>,
    return
  }
  func.func @transform_0(%arg0: i32) -> (i32, i32) {
    %c0_i32 = arith.constant 0 : i32
    %c0_i32_0 = arith.constant 0 : i32
    return %arg0, %c0_i32 : i32, i32
  }
  func.func @transform_1(%arg0: i32) -> (i32, i32) {
    %c0_i32 = arith.constant 0 : i32
    %c0_i32_0 = arith.constant 0 : i32
    return %arg0, %c0_i32 : i32, i32
  }
  func.func @transform_2(%arg0: i32) -> (i32, i32) {
    %c0_i32 = arith.constant 0 : i32
    %c0_i32_0 = arith.constant 0 : i32
    %c0_i32_1 = arith.constant 0 : i32
    return %c0_i32, %c0_i32_0 : i32, i32
  }
  func.func @transform_3(%arg0: i32) -> (i32, i32) {
    %c0_i32 = arith.constant 0 : i32
    %c0_i32_0 = arith.constant 0 : i32
    %c0_i32_1 = arith.constant 0 : i32
    return %c0_i32, %c0_i32_0 : i32, i32
  }
  func.func @transform_4(%arg0: i32) -> (i32, i32) {
    %c0_i32 = arith.constant 0 : i32
    %c0_i32_0 = arith.constant 0 : i32
    %c0_i32_1 = arith.constant 0 : i32
    return %c0_i32, %c0_i32_0 : i32, i32
  }
  func.func @transform_5(%arg0: i32) -> (i32, i32) {
    %c0_i32 = arith.constant 0 : i32
    %c0_i32_0 = arith.constant 0 : i32
    %c0_i32_1 = arith.constant 0 : i32
    return %c0_i32, %c0_i32_0 : i32, i32
  }
  func.func @transform_6(%arg0: i32) -> (i32, i32) {
    %c0_i32 = arith.constant 0 : i32
    %c0_i32_0 = arith.constant 0 : i32
    %c0_i32_1 = arith.constant 0 : i32
    return %c0_i32, %c0_i32_0 : i32, i32
  }
  func.func @transform_7(%arg0: i32) -> (i32, i32) {
    %c0_i32 = arith.constant 0 : i32
    %c0_i32_0 = arith.constant 0 : i32
    %c0_i32_1 = arith.constant 0 : i32
    return %c0_i32, %c0_i32_0 : i32, i32
  }
  func.func @transform_8(%arg0: i32) -> (i32, i32) {
    %c0_i32 = arith.constant 0 : i32
    %c0_i32_0 = arith.constant 0 : i32
    %c0_i32_1 = arith.constant 0 : i32
    return %c0_i32, %c0_i32_0 : i32, i32
  }
  func.func @transform_9(%arg0: i32) -> (i32, i32) {
    %c0_i32 = arith.constant 0 : i32
    %c0_i32_0 = arith.constant 0 : i32
    %c0_i32_1 = arith.constant 0 : i32
    return %c0_i32, %c0_i32_0 : i32, i32
  }
  func.func @transform_10(%arg0: i32) -> (i32, i32) {
    %c0_i32 = arith.constant 0 : i32
    %c0_i32_0 = arith.constant 0 : i32
    return %arg0, %c0_i32 : i32, i32
  }
}

</mosaic_0001>

<bundles_post_ra>
// kernel: tpu_custom_call.1
= control target key start
LH: loop header
LB: loop body
LE: loop exit
PB: predicated region body
PF: predicated region fallthrough
CT: control target
= control target key end

     0   :  { %15 = vsyncpa [#allocation3], 0  ;;  %s813_s0 = inlined_call_operand.hbm [shape: f32[1,128], index: 0, kind: input, shape index: {}]   ;;  %s814_s1 = inlined_call_operand.hbm [shape: f32[1,64], index: 1, kind: input, shape index: {}]   ;;  %s815_s2 = inlined_call_operand.hbm [shape: f32[128,256], index: 2, kind: input, shape index: {}]   ;;  %s816_s3 = inlined_call_operand.hbm [shape: f32[64,256], index: 3, kind: input, shape index: {}]   ;;  %s817_s4 = inlined_call_operand.vmem [shape: f32[1,256], index: 4, kind: input, shape index: {}]   ;;  %s818_s5 = inlined_call_operand.hbm [shape: f32[256,256], index: 5, kind: input, shape index: {}]   ;;  %s819_s6 = inlined_call_operand.vmem [shape: f32[1,256], index: 6, kind: input, shape index: {}]   ;;  %s820_s7 = inlined_call_operand.hbm [shape: f32[256,128], index: 7, kind: input, shape index: {}]   ;;  %s821_s8 = inlined_call_operand.vmem [shape: f32[1,128], index: 8, kind: input, shape index: {}]   ;;  %s822_s9 = inlined_call_operand.vmem [shape: f32[1,128], index: 9, kind: input, shape index: {}]   ;;  %s823_s10 = inlined_call_operand.hbm [shape: f32[1,128], index: 10, kind: output, shape index: {}]  }
   0x1   :  { %16 = vsyncpa [#allocation6], 0 }
   0x2   :  { %17 = vsyncpa [#allocation9], 0 }
   0x3   :  { %18 = vsyncpa [#allocation12], 0  ;;  %s36_s15 = sshll.u32 %s814_s1, 4  ;;  %s37_s15 = int_to_ptr.hbm [resolvable:$true] %s36_s15 }
   0x4   :  { %19 = vsyncpa [#allocation4], 0  ;;  %s712_s16 = smov [#allocation5]   ;;  %s59_s20 = sshll.u32 %s816_s3, 4  ;;  %s60_s20 = int_to_ptr.hbm [resolvable:$true] %s59_s20 }
   0x5   :  { %s38_s17 = sshll.u32 %s712_s16, 4  ;;  %s713_s21 = smov [#allocation8]   ;;  %s39_s17 = int_to_ptr.vmem [resolvable:$true] %s38_s17 }
   0x6   :  { %41 = dma.hbm_to_vmem [thread:$0]  %s37_s15, 16, %s39_s17, [#allocation6]  }
   0x7   :  { %s61_s22 = sshll.u32 %s713_s21, 4  ;;  %s25_s25 = sshll.u32 %s813_s0, 4  ;;  %s62_s22 = int_to_ptr.vmem [resolvable:$true] %s61_s22  ;;  %s26_s25 = int_to_ptr.hbm [resolvable:$true] %s25_s25 }
   0x8   :  { %s714_s1 = smov 256   ;;  %s715_s26 = smov 16  }
   0x9   :  { %67 = dma.hbm_to_vmem [thread:$0]  %s60_s20, 2048, %s62_s22, [#allocation9], %s714_s1, %s714_s1, %s715_s26  }
   0xa   :  { %s46_s29 = sshll.u32 %s815_s2, 4  ;;  %s716_s30 = smov [#allocation2]   ;;  %s47_s29 = int_to_ptr.hbm [resolvable:$true] %s46_s29 }
   0xb   :  { %s27_s11 = sshll.u32 %s716_s30, 4  ;;  %s717_s3 = smov [#allocation7]   ;;  %s28_s11 = int_to_ptr.vmem [resolvable:$true] %s27_s11 }
   0xc   :  { %30 = dma.hbm_to_vmem [thread:$0]  %s26_s25, 16, %s28_s11, [#allocation3]  }
   0xd   :  { %s48_s12 = sshll.u32 %s717_s3, 4  ;;  %s74_s0 = sshll.u32 %s818_s5, 4  ;;  %s49_s12 = int_to_ptr.vmem [resolvable:$true] %s48_s12  ;;  %s75_s0 = int_to_ptr.hbm [resolvable:$true] %s74_s0 }
   0xe   :  { %54 = dma.hbm_to_vmem [thread:$0]  %s47_s29, 4096, %s49_s12, [#allocation6], %s714_s1, %s714_s1, %s715_s26  }
   0xf   :  { %s89_s17 = sshll.u32 %s820_s7, 4  ;;  %s718_s18 = smov [#allocation10]   ;;  %s90_s17 = int_to_ptr.hbm [resolvable:$true] %s89_s17 }
  0x10   :  { %s76_s2 = sshll.u32 %s718_s18, 4  ;;  %s719_s19 = smov [#allocation11]   ;;  %s77_s2 = int_to_ptr.vmem [resolvable:$true] %s76_s2 }
  0x11   :  { %82 = dma.hbm_to_vmem [thread:$0]  %s75_s0, 8192, %s77_s2, [#allocation9], %s714_s1, %s714_s1, %s715_s26  }
  0x12   :  { %s91_s20 = sshll.u32 %s719_s19, 4  ;;  %s720_s21 = smov 128   ;;  %s92_s20 = int_to_ptr.vmem [resolvable:$true] %s91_s20 }
  0x13   :  { %s721_s22 = smov 8  }
  0x14   :  { %97 = dma.hbm_to_vmem [thread:$0]  %s90_s17, 4096, %s92_s20, [#allocation12], %s720_s21, %s720_s21, %s721_s22  }
  0x15   :  { %702 = dma.done.wait [#allocation3], 16  }
  0x16   :  { %703 = vsyncadd [#allocation3], 4294967280 }
  0x17   :  { %704 = dma.done.wait [#allocation6], 4112  }
  0x18   :  { %705 = vsyncadd [#allocation6], 4294963184 }
  0x19   :  { %706 = dma.done.wait [#allocation9], 10240  }
  0x1a   :  { %707 = vsyncadd [#allocation9], 4294957056 }
  0x1b   :  { %708 = dma.done.wait [#allocation12], 4096  }
  0x1c   :  { %709 = vsyncadd [#allocation12], 4294963200  ;;  %v158_v0 = vld [vmem:[#allocation7 + $0xf0] sm:$0xff]  ;;  %v156_v1 = vld [vmem:[#allocation7 + $0xe0] sm:$0xff]  ;;  %vm176_vm0 = vcmask 523264   ;;  %s722_s26 = smov [#allocation13]  }
  0x1d   :  { %v159_v2 = vld [vmem:[#allocation7 + $0xf8] sm:$0xff]  ;;  %220 = vmatpush.msra.mxu2 %v158_v0  ;;  %v157_v3 = vld [vmem:[#allocation7 + $0xe8] sm:$0xff]  ;;  %v154_v4 = vld [vmem:[#allocation7 + $0xd0] sm:$0xff]  ;;  %s504_s27 = sshll.u32 %s722_s26, 4  ;;  %s506_s30 = sshll.u32 %s823_s10, 4  ;;  %s505_s27 = int_to_ptr.vmem [resolvable:$true] %s504_s27  ;;  %s507_s30 = int_to_ptr.hbm [resolvable:$true] %s506_s30 }
  0x1e   :  { %240 = vmatpush.msra.mxu3 %v159_v2  ;;  %v155_v5 = vld [vmem:[#allocation7 + $0xd8] sm:$0xff]  ;;  %v152_v6 = vld [vmem:[#allocation7 + $0xc0] sm:$0xff]  ;;  %v153_v7 = vld [vmem:[#allocation7 + $0xc8] sm:$0xff] }
  0x1f   :  { %221 = vmatpush.msra.mxu2 %v156_v1  ;;  %v150_v8 = vld [vmem:[#allocation7 + $0xb0] sm:$0xff]  ;;  %v151_v9 = vld [vmem:[#allocation7 + $0xb8] sm:$0xff]  ;;  %v148_v10 = vld [vmem:[#allocation7 + $0xa0] sm:$0xff] }
  0x20   :  { %241 = vmatpush.msra.mxu3 %v157_v3  ;;  %v174_v11 = vld [vmem:[#allocation8 + $0x70] sm:$0xff]  ;;  %v149_v12 = vld [vmem:[#allocation7 + $0xa8] sm:$0xff]  ;;  %v172_v13 = vld [vmem:[#allocation8 + $0x60] sm:$0xff] }
  0x21   :  { %222 = vmatpush.msra.mxu2 %v154_v4  ;;  %188 = vmatpush.msra.mxu0 %v174_v11  ;;  %v175_v14 = vld [vmem:[#allocation8 + $0x78] sm:$0xff]  ;;  %v170_v15 = vld [vmem:[#allocation8 + $0x50] sm:$0xff]  ;;  %v173_v16 = vld [vmem:[#allocation8 + $0x68] sm:$0xff] }
  0x22   :  { %242 = vmatpush.msra.mxu3 %v155_v5  ;;  %v146_v17 = vld [vmem:[#allocation7 + $0x90] sm:$0xff]  ;;  %v147_v18 = vld [vmem:[#allocation7 + $0x98] sm:$0xff]  ;;  %208 = vmatpush.msra.mxu1 %v175_v14  ;;  %v168_v19 = vld [vmem:[#allocation8 + $0x40] sm:$0xff] }
  0x23   :  { %223 = vmatpush.msra.mxu2 %v152_v6  ;;  %189 = vmatpush.msra.mxu0 %v172_v13  ;;  %v171_v20 = vld [vmem:[#allocation8 + $0x58] sm:$0xff]  ;;  %v144_v21 = vld [vmem:[#allocation7 + $0x80] sm:$0xff]  ;;  %v145_v22 = vld [vmem:[#allocation7 + $0x88] sm:$0xff] }
  0x24   :  { %243 = vmatpush.msra.mxu3 %v153_v7  ;;  %209 = vmatpush.msra.mxu1 %v173_v16  ;;  %v166_v23 = vld [vmem:[#allocation8 + $0x30] sm:$0xff]  ;;  %v169_v24 = vld [vmem:[#allocation8 + $0x48] sm:$0xff]  ;;  %v143_v26 = vld [vmem:[#allocation7 + $0x78] sm:$0xff] }
  0x25   :  { %224 = vmatpush.msra.mxu2 %v150_v8  ;;  %190 = vmatpush.msra.mxu0 %v170_v15  ;;  %v142_v25 = vld [vmem:[#allocation7 + $0x70] sm:$0xff]  ;;  %v164_v27 = vld [vmem:[#allocation8 + $0x20] sm:$0xff]  ;;  %v167_v28 = vld [vmem:[#allocation8 + $0x38] sm:$0xff] }
  0x26   :  { %244 = vmatpush.msra.mxu3 %v151_v9  ;;  %210 = vmatpush.msra.mxu1 %v171_v20  ;;  %v140_v29 = vld [vmem:[#allocation7 + $0x60] sm:$0xff]  ;;  %v141_v30 = vld [vmem:[#allocation7 + $0x68] sm:$0xff]  ;;  %v162_v31 = vld [vmem:[#allocation8 + $0x10] sm:$0xff] }
  0x27   :  { %225 = vmatpush.msra.mxu2 %v148_v10  ;;  %191 = vmatpush.msra.mxu0 %v168_v19  ;;  %v165_v32 = vld [vmem:[#allocation8 + $0x28] sm:$0xff]  ;;  %v138_v33 = vld [vmem:[#allocation7 + $0x50] sm:$0xff]  ;;  %v139_v34 = vld [vmem:[#allocation7 + $0x58] sm:$0xff] }
  0x28   :  { %245 = vmatpush.msra.mxu3 %v149_v12  ;;  %211 = vmatpush.msra.mxu1 %v169_v24  ;;  %v160_v35 = vld [vmem:[#allocation8] sm:$0xff]  ;;  %v163_v36 = vld [vmem:[#allocation8 + $0x18] sm:$0xff]  ;;  %v137_v38 = vld [vmem:[#allocation7 + $0x48] sm:$0xff] }
  0x29   :  { %226 = vmatpush.msra.mxu2 %v146_v17  ;;  %192 = vmatpush.msra.mxu0 %v166_v23  ;;  %v136_v37 = vld [vmem:[#allocation7 + $0x40] sm:$0xff]  ;;  %v127_v39 = vld [vmem:[#allocation5] sm:$0x1]  ;;  %v161_v40 = vld [vmem:[#allocation8 + $0x8] sm:$0xff] }
  0x2a   :  { %246 = vmatpush.msra.mxu3 %v147_v18  ;;  %212 = vmatpush.msra.mxu1 %v167_v28  ;;  %v134_v41 = vld [vmem:[#allocation7 + $0x30] sm:$0xff]  ;;  %v135_v42 = vld [vmem:[#allocation7 + $0x38] sm:$0xff]  ;;  %v132_v44 = vld [vmem:[#allocation7 + $0x20] sm:$0xff] }
  0x2b   :  { %227 = vmatpush.msra.mxu2 %v144_v21  ;;  %193 = vmatpush.msra.mxu0 %v164_v27  ;;  %v300_v43 = vld [vmem:[#allocation10 + $0xf0] sm:$0xff]  ;;  %v133_v45 = vld [vmem:[#allocation7 + $0x28] sm:$0xff]  ;;  %v298_v46 = vld [vmem:[#allocation10 + $0xe0] sm:$0xff] }
  0x2c   :  { %247 = vmatpush.msra.mxu3 %v145_v22  ;;  %213 = vmatpush.msra.mxu1 %v165_v32  ;;  %v332_v47 = vld [vmem:[#allocation10 + $0x1f0] sm:$0xff]  ;;  %v131_v49 = vld [vmem:[#allocation7 + $0x18] sm:$0xff]  ;;  %v330_v51 = vld [vmem:[#allocation10 + $0x1e0] sm:$0xff] }
  0x2d   :  { %228 = vmatpush.msra.mxu2 %v142_v25  ;;  %194 = vmatpush.msra.mxu0 %v162_v31  ;;  %v130_v48 = vld [vmem:[#allocation7 + $0x10] sm:$0xff]  ;;  %v128_v52 = vld [vmem:[#allocation7] sm:$0xff]  ;;  %v129_v53 = vld [vmem:[#allocation7 + $0x8] sm:$0xff] }
  0x2e   :  { %248 = vmatpush.msra.mxu3 %v143_v26  ;;  %214 = vmatpush.msra.mxu1 %v163_v36  ;;  %v296_v50 = vld [vmem:[#allocation10 + $0xd0] sm:$0xff]  ;;  %v126_v54 = vld [vmem:[#allocation2] sm:$0x1]  ;;  %v294_v57 = vld [vmem:[#allocation10 + $0xc0] sm:$0xff] }
  0x2f   :  { %229 = vmatpush.msra.mxu2 %v140_v29  ;;  %195 = vmatpush.msra.mxu0 %v160_v35  ;;  %v301_v55 = vld [vmem:[#allocation10 + $0xf8] sm:$0xff]  ;;  %v328_v58 = vld [vmem:[#allocation10 + $0x1d0] sm:$0xff]  ;;  %v299_v59 = vld [vmem:[#allocation10 + $0xe8] sm:$0xff] }
  0x30   :  { %249 = vmatpush.msra.mxu3 %v141_v30  ;;  %519 = vmatmul.msk.f32.vlgmr.msra.gmra.mxu0 %vm176_vm0, %v127_v39  ;;  %v333_v56 = vld [vmem:[#allocation10 + $0x1f8] sm:$0xff]  ;;  %v331_v60 = vld [vmem:[#allocation10 + $0x1e8] sm:$0xff]  ;;  %v292_v61 = vld [vmem:[#allocation10 + $0xb0] sm:$0xff] }
  0x31   :  { %230 = vmatpush.msra.mxu2 %v138_v33  ;;  %215 = vmatpush.msra.mxu1 %v161_v40  ;;  %v326_v62 = vld [vmem:[#allocation10 + $0x1c0] sm:$0xff]  ;;  %v297_v63 = vld [vmem:[#allocation10 + $0xd8] sm:$0xff]  ;;  %v324_v2 = vld [vmem:[#allocation10 + $0x1b0] sm:$0xff] }
  0x32   :  { %250 = vmatpush.msra.mxu3 %v139_v34  ;;  %520 = vmatmul.msk.f32.vlgmr.msra.gmra.mxu1 %vm176_vm0, %v127_v39  ;;  %v329_v0 = vld [vmem:[#allocation10 + $0x1d8] sm:$0xff]  ;;  %v290_v1 = vld [vmem:[#allocation10 + $0xa0] sm:$0xff]  ;;  %v295_v3 = vld [vmem:[#allocation10 + $0xc8] sm:$0xff] }
  0x33   :  { %231 = vmatpush.msra.mxu2 %v136_v37  ;;  %340 = vmatpush.msrb.mxu0 %v300_v43  ;;  %v327_v4 = vld [vmem:[#allocation10 + $0x1c8] sm:$0xff]  ;;  %v288_v5 = vld [vmem:[#allocation10 + $0x90] sm:$0xff]  ;;  %v322_v6 = vld [vmem:[#allocation10 + $0x1a0] sm:$0xff] }
  0x34   :  { %251 = vmatpush.msra.mxu3 %v137_v38  ;;  %360 = vmatpush.msrb.mxu1 %v332_v47  ;;  %v293_v7 = vld [vmem:[#allocation10 + $0xb8] sm:$0xff]  ;;  %v286_v9 = vld [vmem:[#allocation10 + $0x80] sm:$0xff]  ;;  %v320_v10 = vld [vmem:[#allocation10 + $0x190] sm:$0xff] }
  0x35   :  { %232 = vmatpush.msra.mxu2 %v134_v41  ;;  %341 = vmatpush.msrb.mxu0 %v298_v46  ;;  %v325_v8 = vld [vmem:[#allocation10 + $0x1b8] sm:$0xff]  ;;  %v291_v11 = vld [vmem:[#allocation10 + $0xa8] sm:$0xff]  ;;  %v284_v13 = vld [vmem:[#allocation10 + $0x70] sm:$0xff] }
  0x36   :  { %252 = vmatpush.msra.mxu3 %v135_v42  ;;  %361 = vmatpush.msrb.mxu1 %v330_v51  ;;  %v323_v12 = vld [vmem:[#allocation10 + $0x1a8] sm:$0xff]  ;;  %v318_v14 = vld [vmem:[#allocation10 + $0x180] sm:$0xff]  ;;  %v289_v15 = vld [vmem:[#allocation10 + $0x98] sm:$0xff] }
  0x37   :  { %233 = vmatpush.msra.mxu2 %v132_v44  ;;  %342 = vmatpush.msrb.mxu0 %v296_v50  ;;  %v321_v16 = vld [vmem:[#allocation10 + $0x198] sm:$0xff]  ;;  %v282_v17 = vld [vmem:[#allocation10 + $0x60] sm:$0xff]  ;;  %v316_v18 = vld [vmem:[#allocation10 + $0x170] sm:$0xff] }
  0x38   :  { %253 = vmatpush.msra.mxu3 %v133_v45  ;;  %362 = vmatpush.msrb.mxu1 %v328_v58  ;;  %v287_v19 = vld [vmem:[#allocation10 + $0x88] sm:$0xff]  ;;  %v280_v21 = vld [vmem:[#allocation10 + $0x50] sm:$0xff]  ;;  %v314_v22 = vld [vmem:[#allocation10 + $0x160] sm:$0xff] }
  0x39   :  { %234 = vmatpush.msra.mxu2 %v130_v48  ;;  %343 = vmatpush.msrb.mxu0 %v294_v57  ;;  %v319_v20 = vld [vmem:[#allocation10 + $0x188] sm:$0xff]  ;;  %v285_v23 = vld [vmem:[#allocation10 + $0x78] sm:$0xff]  ;;  %v278_v25 = vld [vmem:[#allocation10 + $0x40] sm:$0xff] }
  0x3a   :  { %254 = vmatpush.msra.mxu3 %v131_v49  ;;  %363 = vmatpush.msrb.mxu1 %v326_v62  ;;  %v317_v24 = vld [vmem:[#allocation10 + $0x178] sm:$0xff]  ;;  %v312_v26 = vld [vmem:[#allocation10 + $0x150] sm:$0xff]  ;;  %v283_v27 = vld [vmem:[#allocation10 + $0x68] sm:$0xff] }
  0x3b   :  { %235 = vmatpush.msra.mxu2 %v128_v52  ;;  %344 = vmatpush.msrb.mxu0 %v292_v61  ;;  %v315_v28 = vld [vmem:[#allocation10 + $0x168] sm:$0xff]  ;;  %v281_v29 = vld [vmem:[#allocation10 + $0x58] sm:$0xff]  ;;  %v276_v32 = vld [vmem:[#allocation10 + $0x30] sm:$0xff] }
  0x3c   :  { %255 = vmatpush.msra.mxu3 %v129_v53  ;;  %236 = vmatmul.f32.vlgmr.msra.gmra.mxu2 %v126_v54  ;;  %v313_v30 = vld [vmem:[#allocation10 + $0x158] sm:$0xff]  ;;  %v279_v31 = vld [vmem:[#allocation10 + $0x48] sm:$0xff]  ;;  %v310_v33 = vld [vmem:[#allocation10 + $0x140] sm:$0xff] }
  0x3d   :  { %256 = vmatmul.f32.vlgmr.msra.gmra.mxu3 %v126_v54  ;;  %380 = vmatpush.msrb.mxu2 %v301_v55  ;;  %v277_v34 = vld [vmem:[#allocation10 + $0x38] sm:$0xff]  ;;  %v311_v35 = vld [vmem:[#allocation10 + $0x148] sm:$0xff]  ;;  %v274_v36 = vld [vmem:[#allocation10 + $0x20] sm:$0xff] }
  0x3e   :  { %400 = vmatpush.msrb.mxu3 %v333_v56  ;;  %345 = vmatpush.msrb.mxu0 %v290_v1  ;;  %v308_v37 = vld [vmem:[#allocation10 + $0x130] sm:$0xff]  ;;  %v275_v38 = vld [vmem:[#allocation10 + $0x28] sm:$0xff]  ;;  %v309_v39 = vld [vmem:[#allocation10 + $0x138] sm:$0xff] }
  0x3f   :  { %381 = vmatpush.msrb.mxu2 %v299_v59  ;;  %364 = vmatpush.msrb.mxu1 %v324_v2  ;;  %v272_v40 = vld [vmem:[#allocation10 + $0x10] sm:$0xff]  ;;  %v306_v41 = vld [vmem:[#allocation10 + $0x120] sm:$0xff]  ;;  %v273_v42 = vld [vmem:[#allocation10 + $0x18] sm:$0xff] }
  0x40   :  { %401 = vmatpush.msrb.mxu3 %v331_v60  ;;  %346 = vmatpush.msrb.mxu0 %v288_v5  ;;  %v307_v43 = vld [vmem:[#allocation10 + $0x128] sm:$0xff]  ;;  %v270_v44 = vld [vmem:[#allocation10] sm:$0xff]  ;;  %v304_v45 = vld [vmem:[#allocation10 + $0x110] sm:$0xff] }
  0x41   :  { %382 = vmatpush.msrb.mxu2 %v297_v63  ;;  %365 = vmatpush.msrb.mxu1 %v322_v6  ;;  %v271_v46 = vld [vmem:[#allocation10 + $0x8] sm:$0xff]  ;;  %v305_v47 = vld [vmem:[#allocation10 + $0x118] sm:$0xff]  ;;  %v302_v48 = vld [vmem:[#allocation10 + $0x100] sm:$0xff] }
  0x42   :  { %402 = vmatpush.msrb.mxu3 %v329_v0  ;;  %347 = vmatpush.msrb.mxu0 %v286_v9  ;;  %v303_v49 = vld [vmem:[#allocation10 + $0x108] sm:$0xff]  ;;  %v437_v50 = vld [vmem:[#allocation11 + $0x78] sm:$0xff]  ;;  %v436_v51 = vld [vmem:[#allocation11 + $0x70] sm:$0xff] }
  0x43   :  { %383 = vmatpush.msrb.mxu2 %v295_v3  ;;  %366 = vmatpush.msrb.mxu1 %v320_v10  ;;  %v453_v52 = vld [vmem:[#allocation11 + $0xf8] sm:$0xff]  ;;  %v435_v53 = vld [vmem:[#allocation11 + $0x68] sm:$0xff]  ;;  %v452_v54 = vld [vmem:[#allocation11 + $0xf0] sm:$0xff] }
  0x44   :  { %403 = vmatpush.msrb.mxu3 %v327_v4  ;;  %348 = vmatpush.msrb.mxu0 %v284_v13  ;;  %v451_v55 = vld [vmem:[#allocation11 + $0xe8] sm:$0xff]  ;;  %v434_v56 = vld [vmem:[#allocation11 + $0x60] sm:$0xff]  ;;  %v433_v58 = vld [vmem:[#allocation11 + $0x58] sm:$0xff] }
  0x45   :  { %384 = vmatpush.msrb.mxu2 %v293_v7  ;;  %367 = vmatpush.msrb.mxu1 %v318_v14  ;;  %v450_v57 = vld [vmem:[#allocation11 + $0xe0] sm:$0xff]  ;;  %v449_v59 = vld [vmem:[#allocation11 + $0xd8] sm:$0xff]  ;;  %v432_v60 = vld [vmem:[#allocation11 + $0x50] sm:$0xff] }
  0x46   :  { %404 = vmatpush.msrb.mxu3 %v325_v8  ;;  %349 = vmatpush.msrb.mxu0 %v282_v17  ;;  %v448_v61 = vld [vmem:[#allocation11 + $0xd0] sm:$0xff]  ;;  %v431_v62 = vld [vmem:[#allocation11 + $0x48] sm:$0xff]  ;;  %v430_v0 = vld [vmem:[#allocation11 + $0x40] sm:$0xff] }
  0x47   :  { %385 = vmatpush.msrb.mxu2 %v291_v11  ;;  %368 = vmatpush.msrb.mxu1 %v316_v18  ;;  %v447_v63 = vld [vmem:[#allocation11 + $0xc8] sm:$0xff]  ;;  %v446_v1 = vld [vmem:[#allocation11 + $0xc0] sm:$0xff]  ;;  %v429_v2 = vld [vmem:[#allocation11 + $0x38] sm:$0xff] }
  0x48   :  { %405 = vmatpush.msrb.mxu3 %v323_v12  ;;  %350 = vmatpush.msrb.mxu0 %v280_v21  ;;  %v445_v3 = vld [vmem:[#allocation11 + $0xb8] sm:$0xff]  ;;  %v428_v4 = vld [vmem:[#allocation11 + $0x30] sm:$0xff]  ;;  %v427_v5 = vld [vmem:[#allocation11 + $0x28] sm:$0xff] }
  0x49   :  { %386 = vmatpush.msrb.mxu2 %v289_v15  ;;  %369 = vmatpush.msrb.mxu1 %v314_v22  ;;  %v260_v6 = vld [vmem:[%s817_s4] sm:$0x3]  ;;  %v426_v7 = vld [vmem:[#allocation11 + $0x20] sm:$0xff]  ;;  %v444_v21 = vld [vmem:[#allocation11 + $0xb0] sm:$0xff] }
  0x4a   :  { %406 = vmatpush.msrb.mxu3 %v321_v16  ;;  %351 = vmatpush.msrb.mxu0 %v278_v25  ;;  %v262_v10 = vperm.slane %v260_v6, 0  ;;  %v263_v11 = vperm.slane %v260_v6, 1  ;;  %v424_v22 = vld [vmem:[#allocation11 + $0x10] sm:$0xff]  ;;  %v442_v25 = vld [vmem:[#allocation11 + $0xa0] sm:$0xff] }
  0x4b   :  { %387 = vmatpush.msrb.mxu2 %v287_v19  ;;  %370 = vmatpush.msrb.mxu1 %v312_v26  ;;  %v422_v26 = vld [vmem:[#allocation11] sm:$0xff] }
  0x4c   :  { %407 = vmatpush.msrb.mxu3 %v319_v20  ;;  %352 = vmatpush.msrb.mxu0 %v276_v32  ;;  %v425_v20 = vld [vmem:[#allocation11 + $0x18] sm:$0xff] }
  0x4d   :  { %388 = vmatpush.msrb.mxu2 %v285_v23  ;;  %371 = vmatpush.msrb.mxu1 %v310_v33  ;;  %v443_v23 = vld [vmem:[#allocation11 + $0xa8] sm:$0xff] }
  0x4e   :  { %408 = vmatpush.msrb.mxu3 %v317_v24  ;;  %353 = vmatpush.msrb.mxu0 %v274_v36  ;;  %v423_v24 = vld [vmem:[#allocation11 + $0x8] sm:$0xff] }
  0x4f   :  { %389 = vmatpush.msrb.mxu2 %v283_v27  ;;  %372 = vmatpush.msrb.mxu1 %v308_v37  ;;  %v441_v27 = vld [vmem:[#allocation11 + $0x98] sm:$0xff] }
  0x50   :  { %409 = vmatpush.msrb.mxu3 %v315_v28  ;;  %354 = vmatpush.msrb.mxu0 %v272_v40  ;;  %v440_v28 = vld [vmem:[#allocation11 + $0x90] sm:$0xff] }
  0x51   :  { %390 = vmatpush.msrb.mxu2 %v281_v29  ;;  %373 = vmatpush.msrb.mxu1 %v306_v41  ;;  %v439_v29 = vld [vmem:[#allocation11 + $0x88] sm:$0xff] }
  0x52   :  { %410 = vmatpush.msrb.mxu3 %v313_v30  ;;  %355 = vmatpush.msrb.mxu0 %v270_v44  ;;  %v438_v30 = vld [vmem:[#allocation11 + $0x80] sm:$0xff]  ;;  %v454_v44 = vld [vmem:[%s821_s8] sm:$0x1] }
  0x53   :  { %391 = vmatpush.msrb.mxu2 %v279_v31  ;;  %374 = vmatpush.msrb.mxu1 %v304_v45  ;;  %v334_v31 = vld [vmem:[%s819_s6] sm:$0x3] }
  0x54   :  { %411 = vmatpush.msrb.mxu3 %v311_v35  ;;  %455 = vmatpush.msra.mxu0 %v437_v50  ;;  %v336_v32 = vperm.slane %v334_v31, 0  ;;  %v337_v37 = vperm.slane %v334_v31, 1 }
  0x55   :  { %392 = vmatpush.msrb.mxu2 %v277_v34  ;;  %375 = vmatpush.msrb.mxu1 %v302_v48 }
  0x56   :  { %412 = vmatpush.msrb.mxu3 %v309_v39  ;;  %456 = vmatpush.msra.mxu0 %v436_v51 }
  0x57   :  { %393 = vmatpush.msrb.mxu2 %v275_v38  ;;  %475 = vmatpush.msra.mxu1 %v453_v52 }
  0x58   :  { %413 = vmatpush.msrb.mxu3 %v307_v43  ;;  %457 = vmatpush.msra.mxu0 %v435_v53 }
  0x59   :  { %394 = vmatpush.msrb.mxu2 %v273_v42  ;;  %476 = vmatpush.msra.mxu1 %v452_v54 }
  0x5a   :  { %414 = vmatpush.msrb.mxu3 %v305_v47  ;;  %458 = vmatpush.msra.mxu0 %v434_v56 }
  0x5b   :  { %395 = vmatpush.msrb.mxu2 %v271_v46  ;;  %477 = vmatpush.msra.mxu1 %v451_v55 }
  0x5c   :  { %415 = vmatpush.msrb.mxu3 %v303_v49  ;;  %459 = vmatpush.msra.mxu0 %v433_v58  ;;  %v495_v49 = vld [vmem:[%s822_s9] sm:$0x1] }
  0x5d   :  { %478 = vmatpush.msra.mxu1 %v450_v57 }
  0x5e   :  { %460 = vmatpush.msra.mxu0 %v432_v60 }
  0x5f   :  { %479 = vmatpush.msra.mxu1 %v449_v59 }
  0x60   :  { %461 = vmatpush.msra.mxu0 %v431_v62 }
  0x61   :  { %480 = vmatpush.msra.mxu1 %v448_v61 }
  0x62   :  { %462 = vmatpush.msra.mxu0 %v430_v0 }
  0x63   :  { %481 = vmatpush.msra.mxu1 %v447_v63 }
  0x64   :  { %463 = vmatpush.msra.mxu0 %v429_v2 }
  0x65   :  { %482 = vmatpush.msra.mxu1 %v446_v1 }
  0x66   :  { %464 = vmatpush.msra.mxu0 %v428_v4 }
  0x67   :  { %483 = vmatpush.msra.mxu1 %v445_v3 }
  0x68   :  { %465 = vmatpush.msra.mxu0 %v427_v5 }
  0x69   :  { %484 = vmatpush.msra.mxu1 %v444_v21 }
  0x6a   :  { %466 = vmatpush.msra.mxu0 %v426_v7 }
  0x6b   :  { %485 = vmatpush.msra.mxu1 %v443_v23 }
  0x6c   :  { %467 = vmatpush.msra.mxu0 %v425_v20 }
  0x6d   :  { %486 = vmatpush.msra.mxu1 %v442_v25 }
  0x6e   :  { %468 = vmatpush.msra.mxu0 %v424_v22 }
  0x6f   :  { %487 = vmatpush.msra.mxu1 %v441_v27 }
  0x70   :  { %469 = vmatpush.msra.mxu0 %v423_v24 }
  0x71   :  { %488 = vmatpush.msra.mxu1 %v440_v28 }
  0x72   :  { %470 = vmatpush.msra.mxu0 %v422_v26 }
  0x73   :  { %489 = vmatpush.msra.mxu1 %v439_v29 }
  0x75   :  { %490 = vmatpush.msra.mxu1 %v438_v30 }
  0xad   :  { %v197_v8 = vpop.f32.mrf.mxu0 }
  0xaf   :  { %v217_v9 = vpop.f32.mrf.mxu1 }
  0xbf   :  { %v237_v12 = vpop.f32.mrf.mxu2 }
  0xc0   :  { %v257_v13 = vpop.f32.mrf.mxu3  ;;  %v238_v14 = vadd.f32 %v237_v12, %v197_v8 }
  0xc1   :  { %v258_v15 = vadd.f32 %v257_v13, %v217_v9 }
  0xc2   :  { %v266_v16 = vadd.f32 %v262_v10, %v238_v14 }
  0xc3   :  { %v267_v17 = vadd.f32 %v263_v11, %v258_v15 }
  0xc4   :  { %v268_v18 = vmax.f32 %v266_v16, 0.0 }
  0xc5   :  { %v269_v19 = vmax.f32 %v267_v17, 0.0 }
  0xc6   :  { %356 = vmatmul.f32.vlgmr.msrb.gmra.mxu0 %v268_v18  ;;  %396 = vmatmul.f32.vlgmr.msrb.gmra.mxu2 %v268_v18 }
  0xc7   :  { %376 = vmatmul.f32.vlgmr.msrb.gmra.mxu1 %v269_v19  ;;  %416 = vmatmul.f32.vlgmr.msrb.gmra.mxu3 %v269_v19 }
 0x143   :  { %v357_v33 = vpop.f32.mrf.mxu0 }
 0x144   :  { %v358_v34 = vadd.f32 %v357_v33, %v336_v32  ;;  %v377_v35 = vpop.f32.mrf.mxu1 }
 0x146   :  { %v378_v36 = vadd.f32 %v377_v35, %v358_v34 }
 0x148   :  { %v420_v38 = vmax.f32 %v378_v36, 0.0 }
 0x149   :  { %v397_v39 = vpop.f32.mrf.mxu2 }
 0x14a   :  { %v398_v40 = vadd.f32 %v397_v39, %v337_v37  ;;  %471 = vmatmul.f32.vlgmr.msra.gmra.mxu0 %v420_v38  ;;  %v417_v41 = vpop.f32.mrf.mxu3 }
 0x14c   :  { %v418_v42 = vadd.f32 %v417_v41, %v398_v40 }
 0x14e   :  { %v421_v43 = vmax.f32 %v418_v42, 0.0 }
 0x150   :  { %491 = vmatmul.f32.vlgmr.msra.gmra.mxu1 %v421_v43 }
 0x1c7   :  { %v472_v45 = vpop.f32.mrf.mxu0 }
 0x1c8   :  { %v473_v46 = vadd.f32 %v472_v45, %v454_v44 }
 0x1cd   :  { %v492_v47 = vpop.f32.mrf.mxu1 }
 0x1ce   :  { %v493_v48 = vadd.f32 %v492_v47, %v473_v46 }
 0x1d0   :  { %532 = vtanh.f32 %v493_v48 }
 0x1d6   :  { %v533_v50 = vpop.eup %532 }
 0x1d7   :  { %v497_v51 = vmul.f32 %v533_v50, %v495_v49 }
 0x1d9   :  { %498 = vst [vmem:[#allocation13] sm:$0x1] %v497_v51 }
 0x1da   :  { %509 = dma.vmem_to_hbm [thread:$0]  %s505_s27, 16, %s507_s30, [#allocation4]  }
 0x1db   :  { %710 = dma.done.wait [#allocation4], 16  }
 0x1dc   :  { %711 = vsyncadd [#allocation4], 4294967280 }
 0x1dd   :  { %514 = vsyncpa [#allocation3], 1 }
 0x1de   :  { %515 = vsyncpa [#allocation6], 1 }
 0x1df   :  { %516 = vsyncpa [#allocation9], 1 }
 0x1e0   :  { %517 = vsyncpa [#allocation12], 1 }
 0x1e1   :  { %518 = vsyncpa [#allocation4], 1 }

</bundles_post_ra>
